<compile_context>
chip_gen: v6e
topology: v6e:2x2x1
jax: 0.10.0
libtpu: 0.0.40
codegen_flags: <defaults>
</compile_context>

<pallas_src>
import functools

import numpy as np
import jax
import jax.numpy as jnp
from jax.experimental import pallas as pl
from jax.experimental.pallas import tpu as pltpu


# ---------------------------------------------------------------------------
# Kernels
# ---------------------------------------------------------------------------
def _fakequant_kernel(x_ref, scale_ref, offset_ref, out_ref, *, qmin, qmax):
    """Per-channel block kernel: scale/offset broadcast against x.
    (per-lane (1,W) against 2-D x, or per-sublane (ct,1) against 3-D x)."""
    x = x_ref[...].astype(jnp.float32)
    s = scale_ref[...].astype(jnp.float32)
    o = offset_ref[...].astype(jnp.float32)
    if s.ndim < x.ndim:  # static rank fixup (3-D x, 2-D scale)
        pad = (1,) * (x.ndim - s.ndim)
        s = s.reshape(pad + s.shape)
        o = o.reshape(pad + o.shape)
    # ROUND_HALF_EVEN; true divide so ties match torch.round(x / scale).
    q = jnp.clip(jnp.round(x / s) + o, float(qmin), float(qmax))
    out_ref[...] = ((q - o) * s).astype(out_ref.dtype)


def _fq_scalar_kernel(x_ref, scale_ref, offset_ref, out_ref, *, qmin, qmax):
    """Per-tensor block kernel: scale/offset are (1,) f32 scalars in SMEM."""
    s = scale_ref[0]
    o = offset_ref[0]
    x = x_ref[...].astype(jnp.float32)
    q = jnp.clip(jnp.round(x / s) + o, float(qmin), float(qmax))
    out_ref[...] = ((q - o) * s).astype(out_ref.dtype)


# ---------------------------------------------------------------------------
# Tiling helpers
# ---------------------------------------------------------------------------
_BLOCK_BYTES = 2 * 1024 * 1024          # ~2 MiB per x block (native dtype)
_LANE_CAP = 2048
_VMEM_LIMIT = 32 * 1024 * 1024          # safe on v5e/v6e (128 MiB) and v7x (64 MiB)

_PARAMS_2D = pltpu.CompilerParams(
    dimension_semantics=("parallel", "parallel"),
    vmem_limit_bytes=_VMEM_LIMIT)
_PARAMS_3D = pltpu.CompilerParams(
    dimension_semantics=("parallel", "parallel", "parallel"),
    vmem_limit_bytes=_VMEM_LIMIT)


def _cdiv(a, b):
    return (a + b - 1) // b


def _round_up(a, b):
    return _cdiv(max(a, 1), b) * b


def _sublane_unit(dtype):
    """Dtype-aware sublane packing unit (f32: 8, bf16: 16, int8/fp8: 32)."""
    size = jnp.dtype(dtype).itemsize
    if size >= 4:
        return 8
    if size == 2:
        return 16
    return 32


def _tiles_2d(R, W, dtype):
    """Pick (row_tile, lane_tile) for a (R, W) array; ~_BLOCK_BYTES per block."""
    unit = _sublane_unit(dtype)
    itemsize = max(jnp.dtype(dtype).itemsize, 1)
    budget = max(_BLOCK_BYTES // itemsize, unit * 128)
    wt = min(_round_up(W, 128), _LANE_CAP)
    row_cap = unit * 32
    rt_budget = max(unit, (budget // wt) // unit * unit)
    rt = min(_round_up(R, unit), row_cap, rt_budget)
    # Guarantee >= 2 grid steps when the tensor allows it (v7x: 2 TCs/chip).
    if _cdiv(R, rt) * _cdiv(W, wt) == 1 and R > unit:
        rt = _round_up(_cdiv(R, 2), unit)
    return rt, wt


def _tiles_3d(L, C, M, dtype):
    """Pick (l_tile, c_tile, m_tile) for an (L, C, M) array."""
    unit = _sublane_unit(dtype)
    itemsize = max(jnp.dtype(dtype).itemsize, 1)
    budget = max(_BLOCK_BYTES // itemsize, unit * 128)
    mt = min(_round_up(M, 128), _LANE_CAP)
    row_cap = unit * 32
    ct = min(_round_up(C, unit), row_cap,
             max(unit, (budget // mt) // unit * unit))
    lt = max(1, min(L, budget // (ct * mt)))
    # Guarantee >= 2 grid steps when possible.
    if _cdiv(L, lt) * _cdiv(C, ct) * _cdiv(M, mt) == 1:
        if L > 1:
            lt = _cdiv(L, 2)
        elif C > unit:
            ct = _round_up(_cdiv(C, 2), unit)
    return lt, ct, mt


def _fold_lanes(R, W):
    """Fold factor k (divides R) so the lane width k*W becomes lane-dense.

    Prefer the smallest k with (k*W) % 128 == 0 (keeps rows sublane-dense),
    else the smallest k with k*W >= 128, else the widest available."""
    if W >= 128 or W <= 0 or R <= 1:
        return 1
    max_k = max(1, min(R, _LANE_CAP // W))
    divisors = [k for k in range(1, max_k + 1) if R % k == 0]
    aligned = [k for k in divisors if (k * W) % 128 == 0]
    if aligned:
        return aligned[0]
    wide = [k for k in divisors if k * W >= 128]
    if wide:
        return wide[0]
    return divisors[-1]


# ---------------------------------------------------------------------------
# Shared 2-D per-lane path: x2 (R, W), per-lane params of length W.
# ---------------------------------------------------------------------------
def _fq_lanewise(x2, s_row, o_row, qmin, qmax):
    R, W = x2.shape
    k = _fold_lanes(R, W)
    if k > 1:  # fold rows into lanes -> lane-dense unmasked stores
        x2 = x2.reshape(R // k, k * W)
        s_row = jnp.tile(s_row, k)
        o_row = jnp.tile(o_row, k)
        R, W = x2.shape
    rt, wt = _tiles_2d(R, W, x2.dtype)
    s2 = jnp.reshape(s_row, (1, W))
    o2 = jnp.reshape(o_row, (1, W))

    return pl.pallas_call(
        functools.partial(_fakequant_kernel, qmin=qmin, qmax=qmax),
        out_shape=jax.ShapeDtypeStruct((R, W), x2.dtype),
        grid_spec=pltpu.PrefetchScalarGridSpec(
            num_scalar_prefetch=0,
            grid=(_cdiv(R, rt), _cdiv(W, wt)),
            in_specs=[
                pl.BlockSpec((rt, wt), lambda i, j: (i, j)),
                pl.BlockSpec((1, wt), lambda i, j: (0, j)),
                pl.BlockSpec((1, wt), lambda i, j: (0, j)),
            ],
            out_specs=pl.BlockSpec((rt, wt), lambda i, j: (i, j)),
        ),
        compiler_params=_PARAMS_2D,
    )(x2, s2, o2)


# ---------------------------------------------------------------------------
# Per-tensor path: lane-dense flat view, scale/offset in SMEM.
# ---------------------------------------------------------------------------
def _fq_per_tensor(x, scale, offset, qmin, qmax):
    total = int(np.prod(x.shape))
    pad = 0
    lw = next((c for c in (2048, 1024, 512, 256, 128) if total % c == 0), None)
    if lw is not None:
        x2 = x.reshape(total // lw, lw)
    else:
        # Collapse trailing dims to a modest lane width (free reshape).
        w = 1
        for d in reversed(x.shape):
            w *= int(d)
            if w >= 128:
                break
        if 128 <= w <= 8192:
            x2 = x.reshape(total // w, w)
        else:
            # 1-D / tiny / awkward shape: pad flat to a full-vreg multiple
            # (wrapper-side pad; sliced off after — cheaper than lane-sparse
            # masked stores inside the kernel).
            lwp = 1024 if total >= 8192 else 128
            pad = (-total) % lwp
            x_flat = jnp.pad(x.reshape(-1), (0, pad))
            x2 = x_flat.reshape(-1, lwp)

    R, W = x2.shape
    rt, wt = _tiles_2d(R, W, x2.dtype)
    s1 = jnp.asarray(scale, jnp.float32).reshape(1)
    o1 = jnp.asarray(offset, jnp.float32).reshape(1)

    out = pl.pallas_call(
        functools.partial(_fq_scalar_kernel, qmin=qmin, qmax=qmax),
        out_shape=jax.ShapeDtypeStruct((R, W), x2.dtype),
        grid_spec=pltpu.PrefetchScalarGridSpec(
            num_scalar_prefetch=0,
            grid=(_cdiv(R, rt), _cdiv(W, wt)),
            in_specs=[
                pl.BlockSpec((rt, wt), lambda i, j: (i, j)),
                pl.BlockSpec(memory_space=pltpu.MemorySpace.SMEM),
                pl.BlockSpec(memory_space=pltpu.MemorySpace.SMEM),
            ],
            out_specs=pl.BlockSpec((rt, wt), lambda i, j: (i, j)),
        ),
        compiler_params=_PARAMS_2D,
    )(x2, s1, o1)

    if pad:
        out = out.reshape(-1)[:total]
    return out.reshape(x.shape)


# ---------------------------------------------------------------------------
# Per-channel, channel axis == last dim.
# ---------------------------------------------------------------------------
def _fq_channel_last(x, scale, offset, qmin, qmax):
    C = x.shape[-1]
    x2 = x.reshape(-1, C)
    out = _fq_lanewise(x2, jnp.reshape(scale, (-1,)), jnp.reshape(offset, (-1,)),
                       qmin, qmax)
    return out.reshape(x.shape)


# ---------------------------------------------------------------------------
# Per-channel, channel axis not last: (L, C, M) view (free, no transpose).
# Small trailing M is folded into the lane axis with per-element params.
# ---------------------------------------------------------------------------
def _fq_channel_mid(x, scale, offset, axis, qmin, qmax):
    shape = x.shape
    L = int(np.prod(shape[:axis])) if axis > 0 else 1
    C = int(shape[axis])
    M = int(np.prod(shape[axis + 1:]))
    s = jnp.reshape(scale, (-1,))
    o = jnp.reshape(offset, (-1,))

    if M < 128:
        # Fold C*M into the lane axis -> lane-dense stores, per-lane params.
        x2 = x.reshape(L, C * M)
        out = _fq_lanewise(x2, jnp.repeat(s, M), jnp.repeat(o, M), qmin, qmax)
        return out.reshape(shape)

    # Large-M 3-D path: per-sublane scale on the middle axis.
    x3 = x.reshape(L, C, M)
    lt, ct, mt = _tiles_3d(L, C, M, x.dtype)
    s2 = s.reshape(C, 1)
    o2 = o.reshape(C, 1)

    out = pl.pallas_call(
        functools.partial(_fakequant_kernel, qmin=qmin, qmax=qmax),
        out_shape=jax.ShapeDtypeStruct((L, C, M), x.dtype),
        grid_spec=pltpu.PrefetchScalarGridSpec(
            num_scalar_prefetch=0,
            grid=(_cdiv(L, lt), _cdiv(C, ct), _cdiv(M, mt)),
            in_specs=[
                pl.BlockSpec((lt, ct, mt), lambda l, c, m: (l, c, m)),
                pl.BlockSpec((ct, 1), lambda l, c, m: (c, 0)),
                pl.BlockSpec((ct, 1), lambda l, c, m: (c, 0)),
            ],
            out_specs=pl.BlockSpec((lt, ct, mt), lambda l, c, m: (l, c, m)),
        ),
        compiler_params=_PARAMS_3D,
    )(x3, s2, o2)
    return out.reshape(shape)


# ---------------------------------------------------------------------------
# Wrapper mirroring PPQLinearQuantFunction / PPQLinearQuantize.forward
# ---------------------------------------------------------------------------
def ppq_linear_quantize(x, config):
    """config keys: activated (bool), per_channel (bool), channel_axis (int),
    scale, offset (arrays), quant_min, quant_max (python ints)."""
    if not config["activated"]:
        return x  # QuantizationStates.is_activated == False -> bypass
    # TODO(synk): only the ROUND_HALF_EVEN rounding policy (torch.round) is implemented.

    qmin = int(config["quant_min"])
    qmax = int(config["quant_max"])
    scale = jnp.asarray(config["scale"])
    offset = jnp.asarray(config["offset"])

    if config["per_channel"]:
        axis = int(config["channel_axis"]) % x.ndim
        if axis == x.ndim - 1:
            return _fq_channel_last(x, scale, offset, qmin, qmax)
        return _fq_channel_mid(x, scale, offset, axis, qmin, qmax)
    return _fq_per_tensor(x, scale, offset, qmin, qmax)


# ---------------------------------------------------------------------------
# Plain-JAX reference for correctness check
# ---------------------------------------------------------------------------
def _reference(x, config):
    if not config["activated"]:
        return x
    s = jnp.asarray(config["scale"], jnp.float32)
    o = jnp.asarray(config["offset"], jnp.float32)
    if config["per_channel"]:
        shape = [1] * x.ndim
        shape[int(config["channel_axis"]) % x.ndim] = -1
        s = s.reshape(shape)
        o = o.reshape(shape)
    q = jnp.clip(jnp.round(x.astype(jnp.float32) / s) + o,
                 float(config["quant_min"]), float(config["quant_max"]))
    return ((q - o) * s).astype(x.dtype)


if __name__ == "__main__":
    key = jax.random.PRNGKey(0)
    kx, ks, ko, kx2, kx3 = jax.random.split(key, 5)

    # NCHW activation, per-channel quantization along channel_axis=1
    N, C, H, W = 2, 4, 16, 16
    x = jax.random.normal(kx, (N, C, H, W), dtype=jnp.float32) * 3.0

    scale = jax.random.uniform(ks, (C,), minval=0.01, maxval=0.1, dtype=jnp.float32)
    offset = jnp.round(jax.random.uniform(ko, (C,), minval=-8.0, maxval=8.0,
                                          dtype=jnp.float32))

    config_pc = dict(activated=True, per_channel=True, channel_axis=1,
                     scale=scale, offset=offset, quant_min=-128, quant_max=127)
    config_pt = dict(activated=True, per_channel=False, channel_axis=None,
                     scale=jnp.array(0.05, jnp.float32),
                     offset=jnp.array(3.0, jnp.float32),
                     quant_min=-128, quant_max=127)

    # Channel-last per-channel config (NHWC-style tensor, small C -> lane fold)
    x_cl = jnp.transpose(x, (0, 2, 3, 1))  # (N, H, W, C)
    config_cl = dict(activated=True, per_channel=True, channel_axis=3,
                     scale=scale, offset=offset, quant_min=-128, quant_max=127)

    # Non-divisible shape: channel-mid with small trailing M (lane fold path)
    x_odd = jax.random.normal(kx2, (3, 5, 7, 9), dtype=jnp.float32) * 2.0
    scale_odd = jax.random.uniform(ks, (5,), minval=0.02, maxval=0.2,
                                   dtype=jnp.float32)
    offset_odd = jnp.round(jax.random.uniform(ko, (5,), minval=-4.0, maxval=4.0,
                                              dtype=jnp.float32))
    config_odd = dict(activated=True, per_channel=True, channel_axis=1,
                      scale=scale_odd, offset=offset_odd,
                      quant_min=-128, quant_max=127)

    # Per-tensor on an awkward 1-D length (exercises pad + slice fallback)
    x_flat = jax.random.normal(kx3, (10000,), dtype=jnp.float32)

    # Native bf16 inputs (dtype-aware tiling, no wrapper-side casts)
    x_bf16 = x.astype(jnp.bfloat16)
    x_cl_bf16 = x_cl.astype(jnp.bfloat16)

    y_pc = jax.block_until_ready(ppq_linear_quantize(x, config_pc))
    y_pt = jax.block_until_ready(ppq_linear_quantize(x, config_pt))
    y_cl = jax.block_until_ready(ppq_linear_quantize(x_cl, config_cl))
    y_odd = jax.block_until_ready(ppq_linear_quantize(x_odd, config_odd))
    y_fl = jax.block_until_ready(ppq_linear_quantize(x_flat, config_pt))
    y_bf = jax.block_until_ready(ppq_linear_quantize(x_bf16, config_pt))
    y_clbf = jax.block_until_ready(ppq_linear_quantize(x_cl_bf16, config_cl))

    assert jnp.allclose(y_pc, _reference(x, config_pc), atol=1e-5, rtol=1e-5), \
        "per-channel (NCHW) mismatch"
    assert jnp.allclose(y_pt, _reference(x, config_pt), atol=1e-5, rtol=1e-5), \
        "per-tensor mismatch"
    assert jnp.allclose(y_cl, _reference(x_cl, config_cl), atol=1e-5, rtol=1e-5), \
        "per-channel (channel-last) mismatch"
    assert jnp.allclose(y_odd, _reference(x_odd, config_odd), atol=1e-5, rtol=1e-5), \
        "per-channel (odd shape) mismatch"
    assert jnp.allclose(y_fl, _reference(x_flat, config_pt), atol=1e-5, rtol=1e-5), \
        "per-tensor (1-D pad path) mismatch"
    assert y_bf.dtype == jnp.bfloat16 and y_clbf.dtype == jnp.bfloat16
    assert jnp.allclose(y_bf.astype(jnp.float32),
                        _reference(x_bf16, config_pt).astype(jnp.float32),
                        atol=1e-2, rtol=1e-2), "bf16 per-tensor mismatch"
    assert jnp.allclose(y_clbf.astype(jnp.float32),
                        _reference(x_cl_bf16, config_cl).astype(jnp.float32),
                        atol=1e-2, rtol=1e-2), "bf16 channel-last mismatch"

    print("KERNEL_OK")
</pallas_src>

<mosaic_0001>
module attributes {stable_mosaic.version = 11 : i64} {
  func.func @_fakequant_kernel(%arg0: i32, %arg1: i32, %arg2: i32, %arg3: memref<1x8x256xf32, #tpu.memory_space<vmem>>, %arg4: memref<8x1xf32, #tpu.memory_space<vmem>>, %arg5: memref<8x1xf32, #tpu.memory_space<vmem>>, %arg6: memref<1x8x256xf32, #tpu.memory_space<vmem>>) attributes {dimension_semantics = [#tpu.dimension_semantics<parallel>, #tpu.dimension_semantics<parallel>, #tpu.dimension_semantics<parallel>], iteration_bounds = array<i64: 2, 1, 1>, scalar_prefetch = 0 : i64, scratch_operands = 0 : i64, tpu.core_type = #tpu.core_type<tc>, window_params = [{transform_indices = @transform_0, window_bounds = array<i64: 1, 8, 256>}, {transform_indices = @transform_1, window_bounds = array<i64: 8, 1>}, {transform_indices = @transform_2, window_bounds = array<i64: 8, 1>}, {transform_indices = @transform_3, window_bounds = array<i64: 1, 8, 256>}]} {
    %c0 = arith.constant 0 : index
    %c0_0 = arith.constant 0 : index
    %c0_1 = arith.constant 0 : index
    %0 = vector.load %arg3[%c0, %c0_0, %c0_1] : memref<1x8x256xf32, #tpu.memory_space<vmem>>, vector<1x8x256xf32>
    %c0_2 = arith.constant 0 : index
    %c0_3 = arith.constant 0 : index
    %1 = vector.load %arg4[%c0_2, %c0_3] : memref<8x1xf32, #tpu.memory_space<vmem>>, vector<8x1xf32>
    %c0_4 = arith.constant 0 : index
    %c0_5 = arith.constant 0 : index
    %2 = vector.load %arg5[%c0_4, %c0_5] : memref<8x1xf32, #tpu.memory_space<vmem>>, vector<8x1xf32>
    %3 = vector.shape_cast %1 : vector<8x1xf32> to vector<1x8x1xf32>
    %4 = vector.shape_cast %2 : vector<8x1xf32> to vector<1x8x1xf32>
    %5 = vector.broadcast %3 : vector<1x8x1xf32> to vector<1x8x256xf32>
    %6 = arith.divf %0, %5 : vector<1x8x256xf32>
    %7 = math.roundeven %6 : vector<1x8x256xf32>
    %8 = vector.broadcast %4 : vector<1x8x1xf32> to vector<1x8x256xf32>
    %9 = arith.addf %7, %8 : vector<1x8x256xf32>
    %cst = arith.constant -1.280000e+02 : f32
    %cst_6 = arith.constant 1.270000e+02 : f32
    %10 = vector.broadcast %cst : f32 to vector<1x8x256xf32>
    %11 = arith.maximumf %10, %9 : vector<1x8x256xf32>
    %12 = vector.broadcast %cst_6 : f32 to vector<1x8x256xf32>
    %13 = arith.minimumf %12, %11 : vector<1x8x256xf32>
    %14 = vector.broadcast %4 : vector<1x8x1xf32> to vector<1x8x256xf32>
    %15 = arith.subf %13, %14 : vector<1x8x256xf32>
    %16 = vector.broadcast %3 : vector<1x8x1xf32> to vector<1x8x256xf32>
    %17 = arith.mulf %15, %16 : vector<1x8x256xf32>
    %c0_7 = arith.constant 0 : index
    %c0_8 = arith.constant 0 : index
    %c0_9 = arith.constant 0 : index
    %18 = vector.load %arg6[%c0_7, %c0_8, %c0_9] : memref<1x8x256xf32, #tpu.memory_space<vmem>>, vector<1x8x256xf32>
    tpu.vector_store %arg6[%c0_7, %c0_8, %c0_9], %17 {strides = array<i32>} : memref<1x8x256xf32, #tpu.memory_space<vmem>>, vector<1x8x256xf32>,
    return
  }
  func.func @transform_0(%arg0: i32, %arg1: i32, %arg2: i32) -> (i32, i32, i32) {
    %c0_i32 = arith.constant 0 : i32
    return %arg0, %arg1, %arg2 : i32, i32, i32
  }
  func.func @transform_1(%arg0: i32, %arg1: i32, %arg2: i32) -> (i32, i32) {
    %c0_i32 = arith.constant 0 : i32
    %c0_i32_0 = arith.constant 0 : i32
    return %arg1, %c0_i32 : i32, i32
  }
  func.func @transform_2(%arg0: i32, %arg1: i32, %arg2: i32) -> (i32, i32) {
    %c0_i32 = arith.constant 0 : i32
    %c0_i32_0 = arith.constant 0 : i32
    return %arg1, %c0_i32 : i32, i32
  }
  func.func @transform_3(%arg0: i32, %arg1: i32, %arg2: i32) -> (i32, i32, i32) {
    %c0_i32 = arith.constant 0 : i32
    return %arg0, %arg1, %arg2 : i32, i32, i32
  }
}

</mosaic_0001>

<bundles_post_ra>
// kernel: tpu_custom_call.1
= control target key start
LH: loop header
LB: loop body
LE: loop exit
PB: predicated region body
PF: predicated region fallthrough
CT: control target
= control target key end

     0   :  { %8 = vsyncpa [#allocation3], 0  ;;  %s868_s0 = inlined_call_operand.hbm [shape: f32[2,4,256], index: 0, kind: input, shape index: {}]   ;;  %s869_s1 = inlined_call_operand.vmem [shape: f32[4,1], index: 1, kind: input, shape index: {}]   ;;  %s870_s2 = inlined_call_operand.vmem [shape: f32[4,1], index: 2, kind: input, shape index: {}]   ;;  %s871_s3 = inlined_call_operand.hbm [shape: f32[2,4,256], index: 3, kind: output, shape index: {}]  }
   0x1   :  { %10 = vsyncpa [#allocation3 + $0x1], 0 }
   0x2   :  { %11 = vsyncpa [#allocation4], 0 }
   0x3   :  { %13 = vsyncpa [#allocation4 + $0x1], 0  ;;  %s741_s12 = smov 0   ;;  %s743_s13 = smov 0  }
   0x4   :  { %s745_s14 = smov 0   ;;  %s747_s15 = smov 0  }
   0x5   :  { %s749_s16 = smov 0   ;;  %s751_s17 = smov 0  }
   0x6 LB: > { %s510_s18 = sadd.s32 4294967295, %s710_s17   ;;  %s511_s19 = sadd.s32 4294967294, %s710_s17   ;;  %s710_s17 = sphi %s751_s17, %s19_s17   ;;  %s706_s16 = sphi %s749_s16, %s879_s16   ;;  %s702_s15 = sphi %s747_s15, %s878_s15   ;;  %s698_s14 = sphi %s745_s14, %s877_s14   ;;  %s694_s13 = sphi %s743_s13, %s876_s13   ;;  %s690_s12 = sphi %s741_s12, %s875_s12  }
   0x7   : > { %s38_s20 = sadd.s32 1, %s706_s16  ;;  %s49_s21 = sadd.s32 1, %s698_s14 }
   0x8   : > { %p40_p0 = scmp.ge.s32.totalorder %s38_s20, 2  ;;  %p56_p1 = scmp.ne.s32.totalorder %s698_s14, %s694_s13 }
   0x9   : > { %p57_p2 = scmp.eq.s32.totalorder %s710_s17, 0  ;;  %p62_p3 = scmp.ne.s32.totalorder %s694_s13, %s690_s12 }
   0xa   : > { %s881_s20 = smov (%p40_p0, %s38_s20), 0  ;;  %p63_p5 = scmp.eq.s32.totalorder %s510_s18, 0 }
   0xb   : > { %p58_p4 = por %p57_p2, %p56_p1  ;;  %s42_s22 = ssub.s32 %s706_s16, %s881_s20 }
   0xc   : > { %p142_p6 = scmp.eq.s32.totalorder %s510_s18, 1  ;;  %p47_p7 = scmp.eq.s32.totalorder %s42_s22, 0 }
   0xd   : > { %p784_p8 = por %p63_p5, %p62_p3  ;;  %p148_p10 = scmp.eq.s32.totalorder %s511_s19, 1 }
   0xe   : > { %p788_p9 = por %p142_p6, %p56_p1  ;;  %p515_p12 = scmp.ge.s32.totalorder %s710_s17, 2 }
   0xf   : > { %s793_s25 = scalar_select %p47_p7, %s698_s14, %s49_s21  }
  0x10   : > { %p795_p11 = por %p148_p10, %p62_p3  ;;  %190 = sbr.rel (%p515_p12) target bundleno = 40 (0x28), region = 24 }
  0x15   : > { %193 = sbr.rel (!%p58_p4) target bundleno = 40 (0x28), region = 28  ;;  %s194_s27 = sand.u32 (%p58_p4), 1, %s698_s14  }
  0x16   : > { %s516_s28 = sshll.u32 (%p58_p4), %s194_s27, 4  ;;  %s195_s29 = scalar_lea.sflag (%p58_p4), [#allocation3], %s194_s27 }
  0x17   : > { %s198_s30 = scalar_lea.vmem (%p58_p4), [#allocation2], %s516_s28 }
  0x1a   : > { %206 = vsyncadd %s195_s29, 128  ;;  %s527_s4 = sshll.u32 %s706_s16, 7  ;;  %s215_s5 = sshll.u32 %s198_s30, 4  ;;  %s216_s5 = int_to_ptr.vmem [resolvable:$true] %s215_s5 }
  0x1b   : > { %s213_s8 = scalar_lea.hbm %s868_s0, %s527_s4  ;;  %s622_s9 = scalar_lea.vmem %s216_s5, 128 }
  0x1c   : > { %p623_p13 = scmp.ne.s32.totalorder %s216_s5, %s622_s9  ;;  %s712_s10 = smov [#allocation2]  }
  0x1d   : > { %s624_s11 = sshll.u32 %s712_s10, 4  ;;  %s625_s11 = int_to_ptr.vmem [resolvable:$false] %s624_s11 }
  0x1e   : > { %s626_s18 = scalar_lea.vmem %s625_s11, 512  ;;  %p627_p0 = scmp.lt.s32.totalorder %s216_s5, %s625_s11 }
  0x1f   : > { %p628_p1 = scmp.lt.s32.totalorder %s626_s18, %s622_s9 }
  0x21   : > { %p629_p2 = por %p628_p1, %p627_p0 }
  0x23   : > { %p630_p3 = pnand %p629_p2, %p623_p13 }
  0x25   : > { %633 = shalt.err (!%p630_p3)
}
  0x26   : > { %s713_s19 = smov 128   ;;  %s714_s21 = smov 8  }
  0x27   : > { %221 = dma.hbm_to_vmem [thread:$0]  %s213_s8, 128, %s216_s5, %s195_s29, %s713_s19, %s713_s19, %s714_s21  }
  0x28 PF: > { %p519_p4 = scmp.ge.s32.totalorder %s710_s17, 1  ;;  %p223_p5 = scmp.lt.s32.totalorder %s710_s17, 3 }
  0x2a   : > { %p224_p6 = pnand %p519_p4, %p223_p5 }
  0x2b   : > { %s810_s22 = sand.u32 (!%p224_p6), 1, %s694_s13  }
  0x2c   : > { %227 = sbr.rel (%p224_p6) target bundleno = 238 (0xee), region = 32  ;;  %s520_s27 = sshll.u32 (!%p224_p6), %s810_s22, 4 }
  0x2d   : > { %s230_s28 = scalar_lea.sflag (!%p224_p6), [#allocation3], %s810_s22  ;;  %s233_s30 = scalar_lea.vmem (!%p224_p6), [#allocation2], %s520_s27 }
  0x31   : > { %681 = dma.done.wait (%p784_p8), %s230_s28, 256  }
  0x32   : > { %683 = vsyncadd (%p784_p8), %s230_s28, 4294967040  ;;  %v715_v0 = vmov 0   ;;  %v302_v1 = vld [vmem:[%s869_s1] sm:$0xff]  ;;  %v716_v3 = vmov 839922192   ;;  %v311_v5 = vlaneseq  ;;  %v301_v17 = vld [vmem:[%s233_s30 + $0x8] sm:$0xff] }
  0x33   : > { %607 = vset.pattern.permute.xlu0 %v715_v0  ;;  %v303_v2 = vld [vmem:[%s870_s2] sm:$0xff]  ;;  %v309_v4 = vunpack.c.l.s4 %v716_v3  ;;  %v717_v6 = vmov 1985246804   ;;  %s269_s23 = scalar_lea.vmem [#allocation5], %s520_s27  ;;  %s363_s7 = scalar_lea.sflag [#allocation4], %s810_s22 }
  0x34   : > { %306 = vperm.xlu0 %607, %v302_v1   ;;  %v316_v7 = vunpack.c.l.s4 %v717_v6  ;;  %v312_v9 = vshrl.u32 %v311_v5, 7  ;;  %v300_v16 = vld [vmem:[%s233_s30] sm:$0xff] }
  0x35   : > { %v310_v8 = vunpack.c.0.s8 %v309_v4 }
  0x36   : > { %v317_v10 = vunpack.c.0.s8 %v316_v7 }
  0x37   : > { %v313_v11 = vsub.s32 %v310_v8, %v312_v9 }
  0x38   : > { %332 = vperm.xlu0 %607, %v303_v2   ;;  %v320_v12 = vsub.s32 %v317_v10, %v312_v9 }
  0xaf   : > { %v307_v13 = vpop.permute.xlu0 %306 }
  0xb0   : > { %v314_v14 = vrot.slane %v307_v13, %v313_v11  ;;  %v321_v15 = vrot.slane %v307_v13, %v320_v12 }
  0xb2   : > { %608 = vrcp.f32 %v314_v14 }
  0xb3   : > { %610 = vrcp.f32 %v321_v15  ;;  %v333_v27 = vpop.permute.xlu0 %332 }
  0xb4   : > { %v340_v35 = vrot.slane %v333_v27, %v313_v11  ;;  %v347_v37 = vrot.slane %v333_v27, %v320_v12 }
  0xbf   : > { %v609_v18 = vpop.eup %608 }
  0xc0   : > { %v611_v19 = vpop.eup %610  ;;  %v325_v20 = vmul.f32 %v609_v18, %v300_v16 }
  0xc1   : > { %v327_v21 = vmul.f32 %v611_v19, %v301_v17 }
  0xc2   : > { %v531_v22 = vcvt.f32.s32 %v325_v20  ;;  %v529_v25 = vand.u32 2147483647, %v325_v20  ;;  %v534_v29 = vand.u32 2147483648, %v325_v20 }
  0xc3   : > { %v539_v23 = vcvt.f32.s32 %v327_v21  ;;  %v537_v30 = vand.u32 2147483647, %v327_v21  ;;  %v542_v32 = vand.u32 2147483648, %v327_v21 }
  0xc4   : > { %v532_v24 = vcvt.s32.f32 %v531_v22  ;;  %vm530_vm0 = vcmp.lt.f32.partialorder %v529_v25, 8388608.0 }
  0xc5   : > { %v540_v26 = vcvt.s32.f32 %v539_v23  ;;  %vm538_vm1 = vcmp.lt.f32.partialorder %v537_v30, 8388608.0 }
  0xc6   : > { %v533_v28 = vand.u32 2147483647, %v532_v24 }
  0xc7   : > { %v541_v31 = vand.u32 2147483647, %v540_v26 }
  0xc8   : > { %v535_v33 = vor.u32 %v534_v29, %v533_v28 }
  0xc9   : > { %v543_v34 = vor.u32 %v542_v32, %v541_v31 }
  0xca   : > { %v536_v36 = vsel %vm530_vm0, %v535_v33, %v325_v20 }
  0xcb   : > { %v544_v38 = vsel %vm538_vm1, %v543_v34, %v327_v21  ;;  %v350_v39 = vadd.f32 %v536_v36, %v340_v35 }
  0xcc   : > { %v351_v40 = vadd.f32 %v544_v38, %v347_v37 }
  0xcd   : > { %v352_v41 = vmax.f32 %v350_v39, -128.0 }
  0xce   : > { %v353_v42 = vmax.f32 %v351_v40, -128.0 }
  0xcf   : > { %v354_v43 = vmin.f32 %v352_v41, 127.0 }
  0xd0   : > { %v355_v44 = vmin.f32 %v353_v42, 127.0 }
  0xd1   : > { %v356_v45 = vsub.f32 %v354_v43, %v340_v35 }
  0xd2   : > { %v357_v46 = vsub.f32 %v355_v44, %v347_v37  ;;  %369 = sbr.rel (!%p788_p9) target bundleno = 238 (0xee), region = 40 }
  0xd3   : > { %v358_v47 = vmul.f32 %v356_v45, %v314_v14 }
  0xd4   : > { %v359_v48 = vmul.f32 %v357_v46, %v321_v15 }
  0xd5   : > { %360 = vst [vmem:[%s269_s23] sm:$0xff] %v358_v47 }
  0xd6   : > { %361 = vst [vmem:[%s269_s23 + $0x8] sm:$0xff] %v359_v48 }
  0xd7   : > { %377 = vsyncadd %s363_s7, 128  ;;  %s528_s8 = sshll.u32 %s702_s15, 7  ;;  %s386_s9 = sshll.u32 %s269_s23, 4  ;;  %s387_s9 = int_to_ptr.vmem [resolvable:$true] %s386_s9 }
  0xd8   : > { %s384_s18 = scalar_lea.hbm %s871_s3, %s528_s8  ;;  %s634_s19 = scalar_lea.vmem %s387_s9, 128 }
  0xd9   : > { %p635_p7 = scmp.ne.s32.totalorder %s387_s9, %s634_s19  ;;  %s718_s21 = smov [#allocation5]  }
  0xda   : > { %s636_s27 = sshll.u32 %s718_s21, 4  ;;  %s637_s27 = int_to_ptr.vmem [resolvable:$false] %s636_s27 }
  0xdb   : > { %s638_s28 = scalar_lea.vmem %s637_s27, 512  ;;  %p639_p8 = scmp.lt.s32.totalorder %s387_s9, %s637_s27 }
  0xdc   : > { %p640_p10 = scmp.lt.s32.totalorder %s638_s28, %s634_s19 }
  0xde   : > { %p641_p9 = por %p640_p10, %p639_p8 }
  0xe0   : > { %p642_p13 = pnand %p641_p9, %p635_p7 }
  0xe2   : > { %645 = shalt.err (!%p642_p13)
}
  0xe3   : > { %s646_s24 = scalar_lea.hbm %s384_s18, 128  ;;  %s648_s29 = scalar_lea.hbm %s871_s3, 256 }
  0xe4   : > { %p647_p0 = scmp.ne.s32.totalorder %s384_s18, %s646_s24  ;;  %p649_p1 = scmp.lt.s32.totalorder %s384_s18, %s871_s3 }
  0xe5   : > { %p650_p2 = scmp.lt.s32.totalorder %s648_s29, %s646_s24 }
  0xe7   : > { %p651_p3 = por %p650_p2, %p649_p1 }
  0xe9   : > { %p652_p4 = pnand %p651_p3, %p647_p0 }
  0xeb   : > { %655 = shalt.err (!%p652_p4)
}
  0xec   : > { %s719_s6 = smov 128   ;;  %s720_s23 = smov 8  }
  0xed   : > { %392 = dma.vmem_to_hbm [thread:$0]  %s387_s9, 128, %s384_s18, %s363_s7, %s719_s6, %s719_s6, %s720_s23  }
  0xee PF: > { %s401_s8 = sand.u32 1, %s690_s12   ;;  %p548_p5 = pnand %p515_p12, %p795_p11 }
  0xef   : > { %s402_s10 = scalar_lea.sflag [#allocation4], %s401_s8 }
  0xf0   : > { %p549_p6 = pneg %p548_p5 }
  0xf2   : > { %685 = dma.done.wait (%p549_p6), %s402_s10, 256  }
  0xf3   : > { %687 = vsyncadd (%p549_p6), %s402_s10, 4294967040  ;;  %s19_s17 = sadd.s32 1, %s710_s17   ;;  %s875_s12 = smov %s694_s13 }
  0xf4   : > { %p16_p7 = scmp.ge.s32.totalorder %s19_s17, 4   ;;  %s876_s13 = smov %s698_s14 }
  0xf5   : > { %s877_s14 = smov %s793_s25  ;;  %s878_s15 = smov %s706_s16 }
  0xf6   : > { %s879_s16 = smov %s881_s20  ;;  %18 = sbr.rel (!%p16_p7) target bundleno = 6 (0x6), region = 83 }
  0xfb   :  { %407 = vsyncpa [#allocation3], 1 }
  0xfc   :  { %409 = vsyncpa [#allocation3 + $0x1], 1 }
  0xfd   :  { %410 = vsyncpa [#allocation4], 1 }
  0xfe   :  { %412 = vsyncpa [#allocation4 + $0x1], 1 }

</bundles_post_ra>
